<compile_context>
chip_gen: v6e
topology: v6e:2x2x1
jax: 0.10.0
libtpu: 0.0.40
codegen_flags: <defaults>
</compile_context>

<pallas_src>
import functools

import jax
import jax.numpy as jnp
from jax.experimental import pallas as pl
from jax.experimental.pallas import tpu as pltpu


def _round_up(v, m):
    return (v + m - 1) // m * m


@functools.lru_cache(maxsize=1)
def _vmem_capacity_bytes():
    """Physical VMEM per core, with a conservative (v7x-sized) fallback."""
    try:
        cap = getattr(pltpu.get_tpu_info(), "vmem_capacity_bytes", None)
        if cap:
            return int(cap)
    except Exception:
        pass
    return 64 * 1024 * 1024


def _mlp_kernel(x_ref, w1_ref, b1_ref, w2_ref, b2_ref, o_ref, *,
                mid_chunk, n_chunks):
    """relu(x @ W1 + b1) @ W2 + b2 for one batch tile.

      x_ref:  (TM, in_dim)      pipelined (double-buffered) VMEM tile
      w1_ref: (in_dim, mid_p)   whole array, VMEM-resident, single buffer
      b1_ref: (1, mid_p)
      w2_ref: (mid_p, out_dim)
      b2_ref: (1, out_dim)
      o_ref:  (TM, out_dim)

    The hidden dim is processed in `mid_chunk`-wide slabs so the f32
    intermediate never exceeds (TM, mid_chunk).
    """
    x = x_ref[...]
    acc = None
    for c in range(n_chunks):                       # static unroll, small count
        cols = pl.ds(c * mid_chunk, mid_chunk)      # static, lane-aligned slice
        h = jnp.dot(x, w1_ref[:, cols], preferred_element_type=jnp.float32)
        h = jnp.maximum(h + b1_ref[:, cols], 0.0)   # bias + ReLU in f32 (VPU)
        part = jnp.dot(h.astype(w2_ref.dtype), w2_ref[cols, :],
                       preferred_element_type=jnp.float32)
        acc = part if acc is None else acc + part
    o_ref[...] = (acc + b2_ref[...]).astype(o_ref.dtype)


@jax.jit
def mlp_forward(x, w1, b1, w2, b2):
    B, in_dim = x.shape
    mid_dim = w1.shape[1]
    out_dim = w2.shape[1]
    dtype = x.dtype
    bytes_per = jnp.dtype(dtype).itemsize

    # ---- hidden-dim chunking (padding applied to weights only, inert) ------
    if mid_dim > 1024:
        mid_chunk = 512
    else:
        mid_chunk = _round_up(mid_dim, 128)
    mid_p = _round_up(mid_dim, mid_chunk)
    n_chunks = mid_p // mid_chunk

    # ---- generation-aware VMEM budget ---------------------------------------
    vmem_cap = _vmem_capacity_bytes()
    budget = int(0.78 * vmem_cap)               # headroom for compiler scratch
    resident = bytes_per * (in_dim * mid_p + mid_p * out_dim + mid_p + out_dim)

    # ---- batch tile: dtype-aware sublane rounding, VMEM-capped --------------
    sub = {4: 8, 2: 16, 1: 32}.get(bytes_per, 8)
    if B >= 512:
        tm = 256
        while tm * 2 <= min(B // 2, 1024):      # keep >= 2 tiles for pipelining
            tm *= 2
    else:
        tm = _round_up(B, sub)                  # single tile for small batches

    def act_bytes(t):
        streamed = 2 * bytes_per * t * (in_dim + out_dim)   # x/out double-buf
        hidden = 4 * t * (mid_chunk + out_dim)               # f32 h-chunk + acc
        return streamed + hidden

    while tm > sub and resident + act_bytes(tm) > budget:
        tm = _round_up(max(tm // 2, sub), sub)
    TM = tm

    B_p = _round_up(B, TM)
    num_tiles = B_p // TM
    x_in = x if B_p == B else jnp.pad(x, ((0, B_p - B), (0, 0)))

    # Pad only the weight arrays along the hidden dim (loaded once); zero b1
    # columns stay zero through ReLU and zero w2 rows contribute nothing.
    if mid_p != mid_dim:
        w1 = jnp.pad(w1, ((0, 0), (0, mid_p - mid_dim)))
        b1 = jnp.pad(b1, ((0, mid_p - mid_dim),))
        w2 = jnp.pad(w2, ((0, mid_p - mid_dim), (0, 0)))
    b1_2d = b1.reshape(1, mid_p)
    b2_2d = b2.reshape(1, out_dim)

    needed = resident + act_bytes(TM)
    vmem_limit = int(min(max(2 * needed, 16 * 1024 * 1024), budget))

    cost = pl.CostEstimate(
        flops=2 * B_p * (in_dim * mid_p + mid_p * out_dim),
        transcendentals=0,
        bytes_accessed=bytes_per * (B_p * in_dim + B_p * out_dim
                                    + in_dim * mid_p + mid_p * out_dim
                                    + mid_p + out_dim),
    )

    kernel = functools.partial(_mlp_kernel, mid_chunk=mid_chunk,
                               n_chunks=n_chunks)

    out = pl.pallas_call(
        kernel,
        out_shape=jax.ShapeDtypeStruct((B_p, out_dim), dtype),
        grid_spec=pltpu.PrefetchScalarGridSpec(
            num_scalar_prefetch=0,
            grid=(num_tiles,),
            in_specs=[
                # x tiles stream along the batch axis; natural (unpadded) last
                # dim avoids any extra activation HBM traffic.
                pl.BlockSpec((TM, in_dim), lambda i: (i, 0)),
                # Weights / biases: whole array, VMEM-resident, single buffer.
                pl.BlockSpec(memory_space=pltpu.MemorySpace.VMEM),
                pl.BlockSpec(memory_space=pltpu.MemorySpace.VMEM),
                pl.BlockSpec(memory_space=pltpu.MemorySpace.VMEM),
                pl.BlockSpec(memory_space=pltpu.MemorySpace.VMEM),
            ],
            out_specs=pl.BlockSpec((TM, out_dim), lambda i: (i, 0)),
        ),
        compiler_params=pltpu.CompilerParams(
            # Batch tiles are independent.  (On v7x, CORE_PARALLEL would shard
            # this axis across the 2 TensorCores; "parallel" is the portable
            # choice across v5e/v6e/v7x.)
            dimension_semantics=("parallel",),
            vmem_limit_bytes=vmem_limit,
        ),
        cost_estimate=cost,
    )(x_in, w1, b1_2d, w2, b2_2d)
    # TODO(synk): for weights too large to keep VMEM-resident (esp. v7x 64 MiB),
    # add grid axes over mid/out with an f32 accumulator scratch + pl.when
    # init/finalize instead of whole-array VMEM weights.

    return out if B_p == B else out[:B]


def init_params(key, in_dim, mid_dim, out_dim, dtype=jnp.float32):
    # Mimics nn.Linear's uniform(-1/sqrt(fan_in), 1/sqrt(fan_in)) init.
    k1, k2, k3, k4 = jax.random.split(key, 4)
    bound1 = 1.0 / (in_dim ** 0.5)
    bound2 = 1.0 / (mid_dim ** 0.5)
    w1 = jax.random.uniform(k1, (in_dim, mid_dim), dtype, -bound1, bound1)
    b1 = jax.random.uniform(k2, (mid_dim,), dtype, -bound1, bound1)
    w2 = jax.random.uniform(k3, (mid_dim, out_dim), dtype, -bound2, bound2)
    b2 = jax.random.uniform(k4, (out_dim,), dtype, -bound2, bound2)
    return w1, b1, w2, b2


if __name__ == "__main__":
    # Small shapes that still exercise the batch tiling (2 tiles of 256 rows)
    # and sub-128 feature dims (handled without any activation padding).
    B, in_dim, mid_dim, out_dim = 512, 32, 64, 16

    key = jax.random.PRNGKey(0)
    kx, kp = jax.random.split(key)
    x = jax.random.normal(kx, (B, in_dim), jnp.float32)
    w1, b1, w2, b2 = init_params(kp, in_dim, mid_dim, out_dim)

    out = jax.block_until_ready(mlp_forward(x, w1, b1, w2, b2))

    # Pure-JAX reference (same semantics as the PyTorch module forward).
    ref = jnp.maximum(x @ w1 + b1[None, :], 0.0) @ w2 + b2[None, :]
    assert out.shape == (B, out_dim)
    err = float(jnp.max(jnp.abs(out - ref)))
    assert err < 2e-5, err
    print("KERNEL_OK")
</pallas_src>

<mosaic_0001>
module attributes {stable_mosaic.version = 11 : i64} {
  func.func @_mlp_kernel(%arg0: i32, %arg1: memref<256x32xf32, #tpu.memory_space<vmem>>, %arg2: memref<32x128xf32, #tpu.memory_space<vmem>>, %arg3: memref<1x128xf32, #tpu.memory_space<vmem>>, %arg4: memref<128x16xf32, #tpu.memory_space<vmem>>, %arg5: memref<1x16xf32, #tpu.memory_space<vmem>>, %arg6: memref<256x16xf32, #tpu.memory_space<vmem>>) attributes {dimension_semantics = [#tpu.dimension_semantics<parallel>], iteration_bounds = array<i64: 2>, scalar_prefetch = 0 : i64, scratch_operands = 0 : i64, tpu.core_type = #tpu.core_type<tc>, window_params = [{transform_indices = @transform_0, window_bounds = array<i64: 256, 32>}, {pipeline_mode = #tpu.pipeline_mode<synchronous>, transform_indices = @transform_1, window_bounds = array<i64: 32, 128>}, {pipeline_mode = #tpu.pipeline_mode<synchronous>, transform_indices = @transform_2, window_bounds = array<i64: 1, 128>}, {pipeline_mode = #tpu.pipeline_mode<synchronous>, transform_indices = @transform_3, window_bounds = array<i64: 128, 16>}, {pipeline_mode = #tpu.pipeline_mode<synchronous>, transform_indices = @transform_4, window_bounds = array<i64: 1, 16>}, {transform_indices = @transform_5, window_bounds = array<i64: 256, 16>}]} {
    %c0 = arith.constant 0 : index
    %c0_0 = arith.constant 0 : index
    %0 = vector.load %arg1[%c0, %c0_0] : memref<256x32xf32, #tpu.memory_space<vmem>>, vector<256x32xf32>
    %c0_1 = arith.constant 0 : index
    %c0_2 = arith.constant 0 : index
    %1 = vector.load %arg2[%c0_1, %c0_2] : memref<32x128xf32, #tpu.memory_space<vmem>>, vector<32x128xf32>
    %cst = arith.constant dense<0.000000e+00> : vector<256x128xf32>
    %2 = tpu.matmul %0, %1, %cst {dimension_numbers = #tpu.dot_dimension_numbers<[1], [0], [0], [1], [0, 0, 1, 1], [], []>} : vector<256x32xf32>, vector<32x128xf32>, vector<256x128xf32> -> vector<256x128xf32>
    %c0_3 = arith.constant 0 : index
    %c0_4 = arith.constant 0 : index
    %3 = vector.load %arg3[%c0_3, %c0_4] : memref<1x128xf32, #tpu.memory_space<vmem>>, vector<1x128xf32>
    %4 = vector.broadcast %3 : vector<1x128xf32> to vector<256x128xf32>
    %5 = arith.addf %2, %4 : vector<256x128xf32>
    %cst_5 = arith.constant 0.000000e+00 : f32
    %6 = vector.broadcast %cst_5 : f32 to vector<256x128xf32>
    %7 = arith.maximumf %5, %6 : vector<256x128xf32>
    %c0_6 = arith.constant 0 : index
    %c0_7 = arith.constant 0 : index
    %8 = vector.load %arg4[%c0_6, %c0_7] : memref<128x16xf32, #tpu.memory_space<vmem>>, vector<128x16xf32>
    %cst_8 = arith.constant dense<0.000000e+00> : vector<256x16xf32>
    %9 = tpu.matmul %7, %8, %cst_8 {dimension_numbers = #tpu.dot_dimension_numbers<[1], [0], [0], [1], [0, 0, 1, 1], [], []>} : vector<256x128xf32>, vector<128x16xf32>, vector<256x16xf32> -> vector<256x16xf32>
    %c0_9 = arith.constant 0 : index
    %c0_10 = arith.constant 0 : index
    %10 = vector.load %arg5[%c0_9, %c0_10] : memref<1x16xf32, #tpu.memory_space<vmem>>, vector<1x16xf32>
    %11 = vector.broadcast %10 : vector<1x16xf32> to vector<256x16xf32>
    %12 = arith.addf %9, %11 : vector<256x16xf32>
    %c0_11 = arith.constant 0 : index
    %c0_12 = arith.constant 0 : index
    %13 = vector.load %arg6[%c0_11, %c0_12] : memref<256x16xf32, #tpu.memory_space<vmem>>, vector<256x16xf32>
    tpu.vector_store %arg6[%c0_11, %c0_12], %12 {strides = array<i32>} : memref<256x16xf32, #tpu.memory_space<vmem>>, vector<256x16xf32>,
    return
  }
  func.func @transform_0(%arg0: i32) -> (i32, i32) {
    %c0_i32 = arith.constant 0 : i32
    %c0_i32_0 = arith.constant 0 : i32
    return %arg0, %c0_i32 : i32, i32
  }
  func.func @transform_1(%arg0: i32) -> (i32, i32) {
    %c0_i32 = arith.constant 0 : i32
    %c0_i32_0 = arith.constant 0 : i32
    %c0_i32_1 = arith.constant 0 : i32
    return %c0_i32, %c0_i32_0 : i32, i32
  }
  func.func @transform_2(%arg0: i32) -> (i32, i32) {
    %c0_i32 = arith.constant 0 : i32
    %c0_i32_0 = arith.constant 0 : i32
    %c0_i32_1 = arith.constant 0 : i32
    return %c0_i32, %c0_i32_0 : i32, i32
  }
  func.func @transform_3(%arg0: i32) -> (i32, i32) {
    %c0_i32 = arith.constant 0 : i32
    %c0_i32_0 = arith.constant 0 : i32
    %c0_i32_1 = arith.constant 0 : i32
    return %c0_i32, %c0_i32_0 : i32, i32
  }
  func.func @transform_4(%arg0: i32) -> (i32, i32) {
    %c0_i32 = arith.constant 0 : i32
    %c0_i32_0 = arith.constant 0 : i32
    %c0_i32_1 = arith.constant 0 : i32
    return %c0_i32, %c0_i32_0 : i32, i32
  }
  func.func @transform_5(%arg0: i32) -> (i32, i32) {
    %c0_i32 = arith.constant 0 : i32
    %c0_i32_0 = arith.constant 0 : i32
    return %arg0, %c0_i32 : i32, i32
  }
}

</mosaic_0001>

<bundles_post_ra>
// kernel: mlp_forward.1
= control target key start
LH: loop header
LB: loop body
LE: loop exit
PB: predicated region body
PF: predicated region fallthrough
CT: control target
= control target key end

     0   :  { %s1305_s18 = smov 0   ;;  %s1595_s0 = inlined_call_operand.vmem [shape: f32[512,32], index: 0, kind: input, shape index: {}]   ;;  %s1596_s1 = inlined_call_operand.vmem [shape: f32[32,128], index: 1, kind: input, shape index: {}]   ;;  %s1597_s2 = inlined_call_operand.vmem [shape: f32[1,128], index: 2, kind: input, shape index: {}]   ;;  %s1598_s3 = inlined_call_operand.vmem [shape: f32[128,16], index: 3, kind: input, shape index: {}]   ;;  %s1599_s4 = inlined_call_operand.vmem [shape: f32[1,16], index: 4, kind: input, shape index: {}]   ;;  %s1600_s5 = inlined_call_operand.vmem [shape: f32[512,16], index: 5, kind: output, shape index: {}]  }
   0x1 LB: > { %s962_s19 = sadd.s32 4294967295, %s1273_s18   ;;  %p966_p0 = scmp.ge.s32.totalorder %s1273_s18, 1  ;;  %s1273_s18 = sphi %s1305_s18, %s15_s18  }
   0x2   : > { %p188_p1 = scmp.lt.s32.totalorder %s1273_s18, 3 }
   0x4   : > { %p189_p2 = pnand %p966_p0, %p188_p1 }
   0x5   : > { %s967_s24 = sshll.u32 (!%p189_p2), %s962_s19, 5 }
   0x6   : > { %192 = sbr.rel (%p189_p2) target bundleno = 478 (0x1de), region = 40  ;;  %p217_p3 = scmp.lt.s32.totalorder (!%p189_p2), %s967_s24, 63 }
   0xb   : > { %v263_v0 = vld [vmem:[%s1596_s1 + $0x18] sm:$0xff]  ;;  %v262_v1 = vld [vmem:[%s1596_s1 + $0x10] sm:$0xff]  ;;  %v261_v3 = vld [vmem:[%s1596_s1 + $0x8] sm:$0xff]  ;;  %s1602_s24 = smov (!%p217_p3, %s967_s24), 63  ;;  %vm271_vm0 = vcmask 261120   ;;  %vm873_vm1 = vcmask 130048  }
   0xc   : > { %1091 = vmatprep.subr.mxu0 %v263_v0  ;;  %v640_v2 = vld [vmem:[%s1598_s3 + $0x78] sm:$0xff]  ;;  %v639_v4 = vld [vmem:[%s1598_s3 + $0x70] sm:$0xff]  ;;  %v260_v5 = vld [vmem:[%s1596_s1] sm:$0xff]  ;;  %s968_s8 = sshll.u32 %s1602_s24, 3 }
   0xd   : > { %1092 = vmatpush3.msra.mxu0 %v263_v0  ;;  %1227 = vmatprep.subr.mxu1 %v640_v2  ;;  %v638_v6 = vld [vmem:[%s1598_s3 + $0x68] sm:$0xff]  ;;  %s1342_s13 = scalar_lea.vmem %s1595_s0, %s968_s8  ;;  %v637_v11 = vld [vmem:[%s1598_s3 + $0x60] sm:$0xff]  ;;  %v636_v14 = vld [vmem:[%s1598_s3 + $0x58] sm:$0xff]  ;;  %s1494_s26 = scalar_lea.vmem %s1600_s5, %s968_s8 }
   0xe   : > { %1093 = vmatprep.subr.mxu0 %v262_v1  ;;  %1243 = vmatpush3.msra.mxu1 %v640_v2  ;;  %v228_v7 = vld [vmem:[%s1342_s13] sm:$0xff]  ;;  %v229_v8 = vld [vmem:[%s1342_s13 + $0x8] sm:$0xff]  ;;  %v230_v9 = vld [vmem:[%s1342_s13 + $0x10] sm:$0xff] }
   0xf   : > { %1094 = vmatpush3.msra.mxu0 %v262_v1  ;;  %1228 = vmatprep.subr.mxu1 %v639_v4  ;;  %v231_v10 = vld [vmem:[%s1342_s13 + $0x18] sm:$0xff]  ;;  %v232_v12 = vld [vmem:[%s1342_s13 + $0x20] sm:$0xff]  ;;  %v233_v13 = vld [vmem:[%s1342_s13 + $0x28] sm:$0xff] }
  0x10   : > { %1095 = vmatprep.subr.mxu0 %v261_v3  ;;  %1244 = vmatpush3.msra.mxu1 %v639_v4  ;;  %v234_v15 = vld [vmem:[%s1342_s13 + $0x30] sm:$0xff]  ;;  %v235_v17 = vld [vmem:[%s1342_s13 + $0x38] sm:$0xff]  ;;  %v634_v18 = vld [vmem:[%s1598_s3 + $0x48] sm:$0xff] }
  0x11   : > { %1096 = vmatpush3.msra.mxu0 %v261_v3  ;;  %1229 = vmatprep.subr.mxu1 %v638_v6  ;;  %v635_v16 = vld [vmem:[%s1598_s3 + $0x50] sm:$0xff]  ;;  %v236_v19 = vld [vmem:[%s1342_s13 + $0x40] sm:$0xff]  ;;  %v237_v21 = vld [vmem:[%s1342_s13 + $0x48] sm:$0xff] }
  0x12   : > { %1097 = vmatprep.subr.mxu0 %v260_v5  ;;  %1245 = vmatpush3.msra.mxu1 %v638_v6  ;;  %v633_v20 = vld [vmem:[%s1598_s3 + $0x40] sm:$0xff]  ;;  %v632_v22 = vld [vmem:[%s1598_s3 + $0x38] sm:$0xff]  ;;  %v238_v23 = vld [vmem:[%s1342_s13 + $0x50] sm:$0xff] }
  0x13   : > { %1098 = vmatpush3.msra.mxu0 %v260_v5  ;;  %1099 = vmatprep.mubr.msk.f32.mxu0 %vm271_vm0, %v228_v7  ;;  %v631_v24 = vld [vmem:[%s1598_s3 + $0x30] sm:$0xff]  ;;  %v239_v25 = vld [vmem:[%s1342_s13 + $0x58] sm:$0xff]  ;;  %v630_v26 = vld [vmem:[%s1598_s3 + $0x28] sm:$0xff] }
  0x14   : > { %1100 = vmatmul.mubr.msk.f32.vlgmr.msra.gmra.mxu0 %vm271_vm0, %v229_v8  ;;  %1147 = vmatprep.subr.mxu0 %v640_v2  ;;  %v240_v27 = vld [vmem:[%s1342_s13 + $0x60] sm:$0xff]  ;;  %v241_v29 = vld [vmem:[%s1342_s13 + $0x68] sm:$0xff]  ;;  %v242_v30 = vld [vmem:[%s1342_s13 + $0x70] sm:$0xff] }
  0x15   : > { %1102 = vmatprep.mubr.msk.f32.mxu0 %vm271_vm0, %v230_v9  ;;  %1148 = vmatpush3.msra.mxu0 %v640_v2  ;;  %v629_v28 = vld [vmem:[%s1598_s3 + $0x20] sm:$0xff]  ;;  %v243_v31 = vld [vmem:[%s1342_s13 + $0x78] sm:$0xff]  ;;  %v245_v33 = vld [vmem:[%s1342_s13 + $0x88] sm:$0xff] }
  0x16   : > { %1149 = vmatprep.subr.mxu0 %v639_v4  ;;  %1230 = vmatprep.subr.mxu1 %v637_v11  ;;  %v244_v32 = vld [vmem:[%s1342_s13 + $0x80] sm:$0xff]  ;;  %v246_v34 = vld [vmem:[%s1342_s13 + $0x90] sm:$0xff]  ;;  %v247_v35 = vld [vmem:[%s1342_s13 + $0x98] sm:$0xff] }
  0x17   : > { %1150 = vmatpush3.msra.mxu0 %v639_v4  ;;  %1246 = vmatpush3.msra.mxu1 %v637_v11  ;;  %v248_v36 = vld [vmem:[%s1342_s13 + $0xa0] sm:$0xff]  ;;  %v249_v37 = vld [vmem:[%s1342_s13 + $0xa8] sm:$0xff]  ;;  %v250_v38 = vld [vmem:[%s1342_s13 + $0xb0] sm:$0xff] }
  0x18   : > { %1103 = vmatmul.mubr.msk.f32.gmra.mxu0 %vm271_vm0, %v231_v10  ;;  %1151 = vmatprep.subr.mxu0 %v638_v6  ;;  %v251_v39 = vld [vmem:[%s1342_s13 + $0xb8] sm:$0xff]  ;;  %v252_v40 = vld [vmem:[%s1342_s13 + $0xc0] sm:$0xff]  ;;  %v253_v41 = vld [vmem:[%s1342_s13 + $0xc8] sm:$0xff] }
  0x19   : > { %1105 = vmatprep.mubr.msk.f32.mxu0 %vm271_vm0, %v232_v12  ;;  %1152 = vmatpush3.msra.mxu0 %v638_v6  ;;  %v254_v42 = vld [vmem:[%s1342_s13 + $0xd0] sm:$0xff]  ;;  %v255_v43 = vld [vmem:[%s1342_s13 + $0xd8] sm:$0xff]  ;;  %v256_v44 = vld [vmem:[%s1342_s13 + $0xe0] sm:$0xff] }
  0x1a   : > { %1153 = vmatprep.subr.mxu0 %v637_v11  ;;  %1231 = vmatprep.subr.mxu1 %v636_v14  ;;  %v257_v45 = vld [vmem:[%s1342_s13 + $0xe8] sm:$0xff]  ;;  %v258_v46 = vld [vmem:[%s1342_s13 + $0xf0] sm:$0xff]  ;;  %v259_v47 = vld [vmem:[%s1342_s13 + $0xf8] sm:$0xff] }
  0x1b   : > { %1154 = vmatpush3.msra.mxu0 %v637_v11  ;;  %1247 = vmatpush3.msra.mxu1 %v636_v14  ;;  %v628_v48 = vld [vmem:[%s1598_s3 + $0x18] sm:$0xff]  ;;  %v627_v49 = vld [vmem:[%s1598_s3 + $0x10] sm:$0xff]  ;;  %v626_v50 = vld [vmem:[%s1598_s3 + $0x8] sm:$0xff] }
  0x1c   : > { %1106 = vmatmul.mubr.msk.f32.gmra.mxu0 %vm271_vm0, %v233_v13  ;;  %1155 = vmatprep.subr.mxu0 %v636_v14  ;;  %v625_v51 = vld [vmem:[%s1598_s3] sm:$0xff] }
  0x1d   : > { %1108 = vmatprep.mubr.msk.f32.mxu0 %vm271_vm0, %v234_v15  ;;  %1156 = vmatpush3.msra.mxu0 %v636_v14  ;;  %v1450_v52 = vld [vmem:[%s1597_s2] ss:$0 sm:$0xff] }
  0x1e   : > { %1157 = vmatprep.subr.mxu0 %v635_v16  ;;  %1232 = vmatprep.subr.mxu1 %v635_v16 }
  0x1f   : > { %1158 = vmatpush3.msra.mxu0 %v635_v16  ;;  %1248 = vmatpush3.msra.mxu1 %v635_v16 }
  0x20   : > { %1109 = vmatmul.mubr.msk.f32.gmra.mxu0 %vm271_vm0, %v235_v17  ;;  %1159 = vmatprep.subr.mxu0 %v634_v18 }
  0x21   : > { %1111 = vmatprep.mubr.msk.f32.mxu0 %vm271_vm0, %v236_v19  ;;  %1160 = vmatpush3.msra.mxu0 %v634_v18 }
  0x22   : > { %1161 = vmatprep.subr.mxu0 %v633_v20  ;;  %1233 = vmatprep.subr.mxu1 %v634_v18 }
  0x23   : > { %1162 = vmatpush3.msra.mxu0 %v633_v20  ;;  %1249 = vmatpush3.msra.mxu1 %v634_v18 }
  0x24   : > { %1112 = vmatmul.mubr.msk.f32.gmra.mxu0 %vm271_vm0, %v237_v21  ;;  %1163 = vmatprep.subr.mxu0 %v632_v22 }
  0x25   : > { %1114 = vmatprep.mubr.msk.f32.mxu0 %vm271_vm0, %v238_v23  ;;  %1164 = vmatpush3.msra.mxu0 %v632_v22 }
  0x26   : > { %1165 = vmatprep.subr.mxu0 %v631_v24  ;;  %1234 = vmatprep.subr.mxu1 %v633_v20 }
  0x27   : > { %1166 = vmatpush3.msra.mxu0 %v631_v24  ;;  %1250 = vmatpush3.msra.mxu1 %v633_v20 }
  0x28   : > { %1115 = vmatmul.mubr.msk.f32.gmra.mxu0 %vm271_vm0, %v239_v25  ;;  %1167 = vmatprep.subr.mxu0 %v630_v26 }
  0x29   : > { %1117 = vmatprep.mubr.msk.f32.mxu0 %vm271_vm0, %v240_v27  ;;  %1168 = vmatpush3.msra.mxu0 %v630_v26 }
  0x2a   : > { %1169 = vmatprep.subr.mxu0 %v629_v28  ;;  %1235 = vmatprep.subr.mxu1 %v632_v22 }
  0x2b   : > { %1170 = vmatpush3.msra.mxu0 %v629_v28  ;;  %1251 = vmatpush3.msra.mxu1 %v632_v22 }
  0x2c   : > { %1118 = vmatmul.mubr.msk.f32.gmra.mxu0 %vm271_vm0, %v241_v29  ;;  %1236 = vmatprep.subr.mxu1 %v631_v24 }
  0x2d   : > { %1120 = vmatprep.mubr.msk.f32.mxu0 %vm271_vm0, %v242_v30  ;;  %1252 = vmatpush3.msra.mxu1 %v631_v24 }
  0x2e   : > { %1237 = vmatprep.subr.mxu1 %v630_v26  ;;  %1171 = vmatprep.subr.mxu0 %v628_v48 }
  0x2f   : > { %1253 = vmatpush3.msra.mxu1 %v630_v26  ;;  %1172 = vmatpush3.msra.mxu0 %v628_v48 }
  0x30   : > { %1121 = vmatmul.mubr.msk.f32.gmra.mxu0 %vm271_vm0, %v243_v31  ;;  %1238 = vmatprep.subr.mxu1 %v629_v28 }
  0x31   : > { %1123 = vmatprep.mubr.msk.f32.mxu0 %vm271_vm0, %v244_v32  ;;  %1254 = vmatpush3.msra.mxu1 %v629_v28 }
  0x32   : > { %1239 = vmatprep.subr.mxu1 %v628_v48  ;;  %1173 = vmatprep.subr.mxu0 %v627_v49 }
  0x33   : > { %1255 = vmatpush3.msra.mxu1 %v628_v48  ;;  %1174 = vmatpush3.msra.mxu0 %v627_v49 }
  0x34   : > { %1124 = vmatmul.mubr.msk.f32.gmra.mxu0 %vm271_vm0, %v245_v33  ;;  %1240 = vmatprep.subr.mxu1 %v627_v49 }
  0x35   : > { %1126 = vmatprep.mubr.msk.f32.mxu0 %vm271_vm0, %v246_v34  ;;  %1256 = vmatpush3.msra.mxu1 %v627_v49 }
  0x36   : > { %1175 = vmatprep.subr.mxu0 %v626_v50  ;;  %1241 = vmatprep.subr.mxu1 %v626_v50 }
  0x37   : > { %1176 = vmatpush3.msra.mxu0 %v626_v50  ;;  %1257 = vmatpush3.msra.mxu1 %v626_v50 }
  0x38   : > { %1127 = vmatmul.mubr.msk.f32.gmra.mxu0 %vm271_vm0, %v247_v35  ;;  %1177 = vmatprep.subr.mxu0 %v625_v51 }
  0x39   : > { %1129 = vmatprep.mubr.msk.f32.mxu0 %vm271_vm0, %v248_v36  ;;  %1242 = vmatprep.subr.mxu1 %v625_v51 }
  0x3a   : > { %1178 = vmatpush3.msra.mxu0 %v625_v51  ;;  %1258 = vmatpush3.msra.mxu1 %v625_v51 }
  0x3c   : > { %1130 = vmatmul.mubr.msk.f32.gmra.mxu0 %vm271_vm0, %v249_v37 }
  0x3d   : > { %1132 = vmatprep.mubr.msk.f32.mxu0 %vm271_vm0, %v250_v38 }
  0x40   : > { %1133 = vmatmul.mubr.msk.f32.gmra.mxu0 %vm271_vm0, %v251_v39 }
  0x41   : > { %1135 = vmatprep.mubr.msk.f32.mxu0 %vm271_vm0, %v252_v40 }
  0x44   : > { %1136 = vmatmul.mubr.msk.f32.gmra.mxu0 %vm271_vm0, %v253_v41 }
  0x45   : > { %1138 = vmatprep.mubr.msk.f32.mxu0 %vm271_vm0, %v254_v42 }
  0x48   : > { %1139 = vmatmul.mubr.msk.f32.gmra.mxu0 %vm271_vm0, %v255_v43 }
  0x49   : > { %1141 = vmatprep.mubr.msk.f32.mxu0 %vm271_vm0, %v256_v44 }
  0x4c   : > { %1142 = vmatmul.mubr.msk.f32.gmra.mxu0 %vm271_vm0, %v257_v45 }
  0x4d   : > { %1144 = vmatprep.mubr.msk.f32.mxu0 %vm271_vm0, %v258_v46 }
  0x50   : > { %1145 = vmatmul.mubr.msk.f32.gmra.mxu0 %vm271_vm0, %v259_v47 }
  0xd4   : > { %v1101_v53 = vpop.f32.mrf.mxu0 }
  0xd5   : > { %v440_v54 = vadd.f32 %v1101_v53, %v1450_v52 }
  0xd6   : > { %v434_v55 = vpop.f32.mrf.mxu0 }
  0xd7   : > { %v435_v56 = vadd.f32 %v1450_v52, %v434_v55  ;;  %v594_v59 = vmax.f32 %v440_v54, 0.0 }
  0xd8   : > { %v1104_v57 = vpop.f32.mrf.mxu0 }
  0xd9   : > { %v593_v58 = vmax.f32 %v435_v56, 0.0  ;;  %v450_v60 = vadd.f32 %v1104_v57, %v1450_v52 }
  0xda   : > { %v444_v61 = vpop.f32.mrf.mxu0 }
  0xdb   : > { %v445_v62 = vadd.f32 %v1450_v52, %v444_v61  ;;  %1179 = vmatprep.mubr.f32.mxu0 %v593_v58  ;;  %v596_v1 = vmax.f32 %v450_v60, 0.0 }
  0xdc   : > { %v1107_v63 = vpop.f32.mrf.mxu0  ;;  %1180 = vmatmul.mubr.f32.vlgmr.msra.gmra.mxu0 %v594_v59 }
  0xdd   : > { %v595_v0 = vmax.f32 %v445_v62, 0.0  ;;  %v460_v2 = vadd.f32 %v1107_v63, %v1450_v52 }
  0xde   : > { %v454_v3 = vpop.f32.mrf.mxu0 }
  0xdf   : > { %v455_v4 = vadd.f32 %v1450_v52, %v454_v3  ;;  %1182 = vmatprep.mubr.f32.mxu0 %v595_v0  ;;  %v598_v7 = vmax.f32 %v460_v2, 0.0 }
  0xe0   : > { %v1110_v5 = vpop.f32.mrf.mxu0  ;;  %1183 = vmatmul.mubr.f32.gmra.mxu0 %v596_v1 }
  0xe1   : > { %v597_v6 = vmax.f32 %v455_v4, 0.0  ;;  %v470_v8 = vadd.f32 %v1110_v5, %v1450_v52 }
  0xe2   : > { %v464_v9 = vpop.f32.mrf.mxu0 }
  0xe3   : > { %1185 = vmatprep.mubr.f32.mxu0 %v597_v6  ;;  %v465_v10 = vadd.f32 %v1450_v52, %v464_v9  ;;  %v600_v13 = vmax.f32 %v470_v8, 0.0 }
  0xe4   : > { %v1113_v11 = vpop.f32.mrf.mxu0  ;;  %1186 = vmatmul.mubr.f32.gmra.mxu0 %v598_v7 }
  0xe5   : > { %v599_v12 = vmax.f32 %v465_v10, 0.0  ;;  %v480_v14 = vadd.f32 %v1113_v11, %v1450_v52 }
  0xe6   : > { %v474_v15 = vpop.f32.mrf.mxu0 }
  0xe7   : > { %v475_v16 = vadd.f32 %v1450_v52, %v474_v15  ;;  %1188 = vmatprep.mubr.f32.mxu1 %v599_v12  ;;  %v602_v19 = vmax.f32 %v480_v14, 0.0 }
  0xe8   : > { %v1116_v17 = vpop.f32.mrf.mxu0  ;;  %1189 = vmatmul.mubr.f32.vlgmr.msra.gmra.mxu1 %v600_v13 }
  0xe9   : > { %v601_v18 = vmax.f32 %v475_v16, 0.0  ;;  %v490_v20 = vadd.f32 %v1116_v17, %v1450_v52 }
  0xea   : > { %v484_v21 = vpop.f32.mrf.mxu0 }
  0xeb   : > { %v485_v22 = vadd.f32 %v1450_v52, %v484_v21  ;;  %1191 = vmatprep.mubr.f32.mxu1 %v601_v18  ;;  %v604_v25 = vmax.f32 %v490_v20, 0.0 }
  0xec   : > { %v1119_v23 = vpop.f32.mrf.mxu0  ;;  %1192 = vmatmul.mubr.f32.gmra.mxu1 %v602_v19 }
  0xed   : > { %v603_v24 = vmax.f32 %v485_v22, 0.0  ;;  %v500_v26 = vadd.f32 %v1119_v23, %v1450_v52  ;;  %v1487_v22 = vld [vmem:[%s1599_s4] ss:$0 sm:$0xff] }
  0xee   : > { %v494_v27 = vpop.f32.mrf.mxu0 }
  0xef   : > { %v495_v28 = vadd.f32 %v1450_v52, %v494_v27  ;;  %1194 = vmatprep.mubr.f32.mxu1 %v603_v24  ;;  %v606_v31 = vmax.f32 %v500_v26, 0.0 }
  0xf0   : > { %v1122_v29 = vpop.f32.mrf.mxu0  ;;  %1195 = vmatmul.mubr.f32.gmra.mxu1 %v604_v25 }
  0xf1   : > { %v605_v30 = vmax.f32 %v495_v28, 0.0  ;;  %v510_v32 = vadd.f32 %v1122_v29, %v1450_v52 }
  0xf2   : > { %v504_v33 = vpop.f32.mrf.mxu0 }
  0xf3   : > { %v505_v34 = vadd.f32 %v1450_v52, %v504_v33  ;;  %1197 = vmatprep.mubr.f32.mxu1 %v605_v30  ;;  %v608_v37 = vmax.f32 %v510_v32, 0.0 }
  0xf4   : > { %v1125_v35 = vpop.f32.mrf.mxu0  ;;  %1198 = vmatmul.mubr.f32.gmra.mxu1 %v606_v31 }
  0xf5   : > { %v607_v36 = vmax.f32 %v505_v34, 0.0  ;;  %v520_v38 = vadd.f32 %v1125_v35, %v1450_v52 }
  0xf6   : > { %v514_v39 = vpop.f32.mrf.mxu0 }
  0xf7   : > { %v515_v40 = vadd.f32 %v1450_v52, %v514_v39  ;;  %1200 = vmatprep.mubr.f32.mxu1 %v607_v36  ;;  %v610_v43 = vmax.f32 %v520_v38, 0.0 }
  0xf8   : > { %v1128_v41 = vpop.f32.mrf.mxu0  ;;  %1201 = vmatmul.mubr.f32.gmra.mxu1 %v608_v37 }
  0xf9   : > { %v609_v42 = vmax.f32 %v515_v40, 0.0  ;;  %v530_v44 = vadd.f32 %v1128_v41, %v1450_v52 }
  0xfa   : > { %v524_v45 = vpop.f32.mrf.mxu0 }
  0xfb   : > { %v525_v46 = vadd.f32 %v1450_v52, %v524_v45  ;;  %1203 = vmatprep.mubr.f32.mxu1 %v609_v42  ;;  %v612_v49 = vmax.f32 %v530_v44, 0.0 }
  0xfc   : > { %v1131_v47 = vpop.f32.mrf.mxu0  ;;  %1204 = vmatmul.mubr.f32.gmra.mxu1 %v610_v43 }
  0xfd   : > { %v611_v48 = vmax.f32 %v525_v46, 0.0  ;;  %v540_v50 = vadd.f32 %v1131_v47, %v1450_v52 }
  0xfe   : > { %v534_v51 = vpop.f32.mrf.mxu0 }
  0xff   : > { %v535_v53 = vadd.f32 %v1450_v52, %v534_v51  ;;  %1206 = vmatprep.mubr.f32.mxu1 %v611_v48  ;;  %v614_v56 = vmax.f32 %v540_v50, 0.0 }
 0x100   : > { %v1134_v54 = vpop.f32.mrf.mxu0  ;;  %1207 = vmatmul.mubr.f32.gmra.mxu1 %v612_v49 }
 0x101   : > { %v613_v55 = vmax.f32 %v535_v53, 0.0  ;;  %v550_v57 = vadd.f32 %v1134_v54, %v1450_v52 }
 0x102   : > { %v544_v58 = vpop.f32.mrf.mxu0 }
 0x103   : > { %v545_v59 = vadd.f32 %v1450_v52, %v544_v58  ;;  %1209 = vmatprep.mubr.f32.mxu1 %v613_v55  ;;  %v616_v62 = vmax.f32 %v550_v57, 0.0 }
 0x104   : > { %v1137_v60 = vpop.f32.mrf.mxu0  ;;  %1210 = vmatmul.mubr.f32.gmra.mxu1 %v614_v56 }
 0x105   : > { %v615_v61 = vmax.f32 %v545_v59, 0.0  ;;  %v560_v63 = vadd.f32 %v1137_v60, %v1450_v52 }
 0x106   : > { %v554_v0 = vpop.f32.mrf.mxu0 }
 0x107   : > { %v555_v1 = vadd.f32 %v1450_v52, %v554_v0  ;;  %1212 = vmatprep.mubr.f32.mxu1 %v615_v61  ;;  %v618_v4 = vmax.f32 %v560_v63, 0.0 }
 0x108   : > { %v1140_v2 = vpop.f32.mrf.mxu0  ;;  %1213 = vmatmul.mubr.f32.gmra.mxu1 %v616_v62 }
 0x109   : > { %v617_v3 = vmax.f32 %v555_v1, 0.0  ;;  %v570_v5 = vadd.f32 %v1140_v2, %v1450_v52 }
 0x10a   : > { %v564_v6 = vpop.f32.mrf.mxu0 }
 0x10b   : > { %v565_v7 = vadd.f32 %v1450_v52, %v564_v6  ;;  %1215 = vmatprep.mubr.f32.mxu1 %v617_v3  ;;  %v620_v10 = vmax.f32 %v570_v5, 0.0 }
 0x10c   : > { %v1143_v8 = vpop.f32.mrf.mxu0  ;;  %1216 = vmatmul.mubr.f32.gmra.mxu1 %v618_v4 }
 0x10d   : > { %v619_v9 = vmax.f32 %v565_v7, 0.0  ;;  %v580_v11 = vadd.f32 %v1143_v8, %v1450_v52 }
 0x10e   : > { %v574_v12 = vpop.f32.mrf.mxu0 }
 0x10f   : > { %v575_v13 = vadd.f32 %v1450_v52, %v574_v12  ;;  %1218 = vmatprep.mubr.f32.mxu1 %v619_v9  ;;  %v622_v16 = vmax.f32 %v580_v11, 0.0 }
 0x110   : > { %v1146_v14 = vpop.f32.mrf.mxu0  ;;  %1219 = vmatmul.mubr.f32.gmra.mxu1 %v620_v10 }
 0x111   : > { %v621_v15 = vmax.f32 %v575_v13, 0.0  ;;  %v590_v17 = vadd.f32 %v1146_v14, %v1450_v52 }
 0x112   : > { %v584_v18 = vpop.f32.mrf.mxu0 }
 0x113   : > { %v585_v19 = vadd.f32 %v1450_v52, %v584_v18  ;;  %1221 = vmatprep.mubr.f32.mxu1 %v621_v15  ;;  %v624_v21 = vmax.f32 %v590_v17, 0.0 }
 0x114   : > { %1222 = vmatmul.mubr.f32.gmra.mxu1 %v622_v16 }
 0x115   : > { %v623_v20 = vmax.f32 %v585_v19, 0.0 }
 0x117   : > { %1224 = vmatprep.mubr.f32.mxu1 %v623_v20 }
 0x118   : > { %1225 = vmatmul.mubr.f32.gmra.mxu1 %v624_v21 }
 0x19c   : > { %v1181_v52 = vpop.f32.mrf.mxu0 }
 0x19d   : > { %v720_v23 = vadd.f32 %v1181_v52, %v1487_v22 }
 0x19e   : > { %v714_v24 = vpop.f32.mrf.mxu0 }
 0x19f   : > { %875 = vst.msk [vmem:[%s1494_s26 + $0x8] sm:$0xff] %vm873_vm1, %v720_v23  ;;  %v715_v25 = vadd.f32 %v1487_v22, %v714_v24 }
 0x1a0   : > { %v1184_v26 = vpop.f32.mrf.mxu0 }
 0x1a1   : > { %874 = vst.msk [vmem:[%s1494_s26] sm:$0xff] %vm873_vm1, %v715_v25  ;;  %v730_v27 = vadd.f32 %v1184_v26, %v1487_v22 }
 0x1a2   : > { %v724_v28 = vpop.f32.mrf.mxu0 }
 0x1a3   : > { %877 = vst.msk [vmem:[%s1494_s26 + $0x18] sm:$0xff] %vm873_vm1, %v730_v27  ;;  %v725_v29 = vadd.f32 %v1487_v22, %v724_v28 }
 0x1a4   : > { %v1187_v30 = vpop.f32.mrf.mxu0 }
 0x1a5   : > { %876 = vst.msk [vmem:[%s1494_s26 + $0x10] sm:$0xff] %vm873_vm1, %v725_v29  ;;  %v740_v31 = vadd.f32 %v1187_v30, %v1487_v22 }
 0x1a6   : > { %v734_v32 = vpop.f32.mrf.mxu0 }
 0x1a7   : > { %879 = vst.msk [vmem:[%s1494_s26 + $0x28] sm:$0xff] %vm873_vm1, %v740_v31  ;;  %v735_v33 = vadd.f32 %v1487_v22, %v734_v32 }
 0x1a8   : > { %v1190_v34 = vpop.f32.mrf.mxu1 }
 0x1a9   : > { %878 = vst.msk [vmem:[%s1494_s26 + $0x20] sm:$0xff] %vm873_vm1, %v735_v33  ;;  %v750_v35 = vadd.f32 %v1190_v34, %v1487_v22 }
 0x1aa   : > { %v744_v36 = vpop.f32.mrf.mxu1 }
 0x1ab   : > { %881 = vst.msk [vmem:[%s1494_s26 + $0x38] sm:$0xff] %vm873_vm1, %v750_v35  ;;  %v745_v37 = vadd.f32 %v1487_v22, %v744_v36 }
 0x1ac   : > { %v1193_v38 = vpop.f32.mrf.mxu1 }
 0x1ad   : > { %880 = vst.msk [vmem:[%s1494_s26 + $0x30] sm:$0xff] %vm873_vm1, %v745_v37  ;;  %v760_v39 = vadd.f32 %v1193_v38, %v1487_v22 }
 0x1ae   : > { %v754_v40 = vpop.f32.mrf.mxu1 }
 0x1af   : > { %883 = vst.msk [vmem:[%s1494_s26 + $0x48] sm:$0xff] %vm873_vm1, %v760_v39  ;;  %v755_v41 = vadd.f32 %v1487_v22, %v754_v40 }
 0x1b0   : > { %v1196_v42 = vpop.f32.mrf.mxu1 }
 0x1b1   : > { %882 = vst.msk [vmem:[%s1494_s26 + $0x40] sm:$0xff] %vm873_vm1, %v755_v41  ;;  %v770_v43 = vadd.f32 %v1196_v42, %v1487_v22 }
 0x1b2   : > { %v764_v44 = vpop.f32.mrf.mxu1 }
 0x1b3   : > { %885 = vst.msk [vmem:[%s1494_s26 + $0x58] sm:$0xff] %vm873_vm1, %v770_v43  ;;  %v765_v45 = vadd.f32 %v1487_v22, %v764_v44 }
 0x1b4   : > { %v1199_v46 = vpop.f32.mrf.mxu1 }
 0x1b5   : > { %884 = vst.msk [vmem:[%s1494_s26 + $0x50] sm:$0xff] %vm873_vm1, %v765_v45  ;;  %v780_v47 = vadd.f32 %v1199_v46, %v1487_v22 }
 0x1b6   : > { %v774_v48 = vpop.f32.mrf.mxu1 }
 0x1b7   : > { %887 = vst.msk [vmem:[%s1494_s26 + $0x68] sm:$0xff] %vm873_vm1, %v780_v47  ;;  %v775_v49 = vadd.f32 %v1487_v22, %v774_v48 }
 0x1b8   : > { %v1202_v50 = vpop.f32.mrf.mxu1 }
 0x1b9   : > { %886 = vst.msk [vmem:[%s1494_s26 + $0x60] sm:$0xff] %vm873_vm1, %v775_v49  ;;  %v790_v51 = vadd.f32 %v1202_v50, %v1487_v22 }
 0x1ba   : > { %v784_v53 = vpop.f32.mrf.mxu1 }
 0x1bb   : > { %889 = vst.msk [vmem:[%s1494_s26 + $0x78] sm:$0xff] %vm873_vm1, %v790_v51  ;;  %v785_v54 = vadd.f32 %v1487_v22, %v784_v53 }
 0x1bc   : > { %v1205_v55 = vpop.f32.mrf.mxu1 }
 0x1bd   : > { %888 = vst.msk [vmem:[%s1494_s26 + $0x70] sm:$0xff] %vm873_vm1, %v785_v54  ;;  %v800_v56 = vadd.f32 %v1205_v55, %v1487_v22 }
 0x1be   : > { %v794_v57 = vpop.f32.mrf.mxu1 }
 0x1bf   : > { %891 = vst.msk [vmem:[%s1494_s26 + $0x88] sm:$0xff] %vm873_vm1, %v800_v56  ;;  %v795_v58 = vadd.f32 %v1487_v22, %v794_v57 }
 0x1c0   : > { %v1208_v59 = vpop.f32.mrf.mxu1 }
 0x1c1   : > { %890 = vst.msk [vmem:[%s1494_s26 + $0x80] sm:$0xff] %vm873_vm1, %v795_v58  ;;  %v810_v60 = vadd.f32 %v1208_v59, %v1487_v22 }
 0x1c2   : > { %v804_v61 = vpop.f32.mrf.mxu1 }
 0x1c3   : > { %893 = vst.msk [vmem:[%s1494_s26 + $0x98] sm:$0xff] %vm873_vm1, %v810_v60  ;;  %v805_v62 = vadd.f32 %v1487_v22, %v804_v61 }
 0x1c4   : > { %v1211_v63 = vpop.f32.mrf.mxu1 }
 0x1c5   : > { %892 = vst.msk [vmem:[%s1494_s26 + $0x90] sm:$0xff] %vm873_vm1, %v805_v62  ;;  %v820_v0 = vadd.f32 %v1211_v63, %v1487_v22 }
 0x1c6   : > { %v814_v1 = vpop.f32.mrf.mxu1 }
 0x1c7   : > { %895 = vst.msk [vmem:[%s1494_s26 + $0xa8] sm:$0xff] %vm873_vm1, %v820_v0  ;;  %v815_v2 = vadd.f32 %v1487_v22, %v814_v1 }
 0x1c8   : > { %v1214_v3 = vpop.f32.mrf.mxu1 }
 0x1c9   : > { %894 = vst.msk [vmem:[%s1494_s26 + $0xa0] sm:$0xff] %vm873_vm1, %v815_v2  ;;  %v830_v4 = vadd.f32 %v1214_v3, %v1487_v22 }
 0x1ca   : > { %v824_v5 = vpop.f32.mrf.mxu1 }
 0x1cb   : > { %897 = vst.msk [vmem:[%s1494_s26 + $0xb8] sm:$0xff] %vm873_vm1, %v830_v4  ;;  %v825_v6 = vadd.f32 %v1487_v22, %v824_v5 }
 0x1cc   : > { %v1217_v7 = vpop.f32.mrf.mxu1 }
 0x1cd   : > { %896 = vst.msk [vmem:[%s1494_s26 + $0xb0] sm:$0xff] %vm873_vm1, %v825_v6  ;;  %v840_v8 = vadd.f32 %v1217_v7, %v1487_v22 }
 0x1ce   : > { %v834_v9 = vpop.f32.mrf.mxu1 }
 0x1cf   : > { %899 = vst.msk [vmem:[%s1494_s26 + $0xc8] sm:$0xff] %vm873_vm1, %v840_v8  ;;  %v835_v10 = vadd.f32 %v1487_v22, %v834_v9 }
 0x1d0   : > { %v1220_v11 = vpop.f32.mrf.mxu1 }
 0x1d1   : > { %898 = vst.msk [vmem:[%s1494_s26 + $0xc0] sm:$0xff] %vm873_vm1, %v835_v10  ;;  %v850_v12 = vadd.f32 %v1220_v11, %v1487_v22 }
 0x1d2   : > { %v844_v13 = vpop.f32.mrf.mxu1 }
 0x1d3   : > { %901 = vst.msk [vmem:[%s1494_s26 + $0xd8] sm:$0xff] %vm873_vm1, %v850_v12  ;;  %v845_v14 = vadd.f32 %v1487_v22, %v844_v13 }
 0x1d4   : > { %v1223_v15 = vpop.f32.mrf.mxu1 }
 0x1d5   : > { %900 = vst.msk [vmem:[%s1494_s26 + $0xd0] sm:$0xff] %vm873_vm1, %v845_v14  ;;  %v860_v16 = vadd.f32 %v1223_v15, %v1487_v22 }
 0x1d6   : > { %v854_v17 = vpop.f32.mrf.mxu1 }
 0x1d7   : > { %903 = vst.msk [vmem:[%s1494_s26 + $0xe8] sm:$0xff] %vm873_vm1, %v860_v16  ;;  %v855_v18 = vadd.f32 %v1487_v22, %v854_v17 }
 0x1d8   : > { %v1226_v19 = vpop.f32.mrf.mxu1 }
 0x1d9   : > { %902 = vst.msk [vmem:[%s1494_s26 + $0xe0] sm:$0xff] %vm873_vm1, %v855_v18  ;;  %v870_v20 = vadd.f32 %v1226_v19, %v1487_v22 }
 0x1da   : > { %v864_v21 = vpop.f32.mrf.mxu1 }
 0x1db   : > { %905 = vst.msk [vmem:[%s1494_s26 + $0xf8] sm:$0xff] %vm873_vm1, %v870_v20  ;;  %v865_v52 = vadd.f32 %v1487_v22, %v864_v21 }
 0x1dd   : > { %904 = vst.msk [vmem:[%s1494_s26 + $0xf0] sm:$0xff] %vm873_vm1, %v865_v52 }
 0x1de PF: > { %s15_s18 = sadd.s32 1, %s1273_s18  }
 0x1df   : > { %p12_p4 = scmp.ge.s32.totalorder %s15_s18, 4  }
 0x1e1   :  { %14 = sbr.rel (!%p12_p4) target bundleno = 1 (0x1), region = 70 }

</bundles_post_ra>
